<compile_context>
chip_gen: v5e
topology: v5e:2x2
jax: 0.10.0
libtpu: 0.0.40
codegen_flags: <defaults>
</compile_context>

<pallas_src>
from functools import partial

import jax
import jax.numpy as jnp
from jax.experimental import pallas as pl
from jax.experimental.pallas import tpu as pltpu


def dlrm_kernel(cat_ref, price_ref,
                wp_ref, bp_ref,
                wb1_ref, bb1_ref, wb2_ref, bb2_ref,
                w1p_ref, w1h_ref, bt1_ref, wt2c_ref, bt2_ref,
                out_ref, *, n_cat, emb_dim):
    E = emb_dim
    F = n_cat + 1

    # ---- price projection:  dense^T = Wp @ price^T + bp ---------------------
    # [E,1] x [1,TB] is a degenerate K=1 matmul -> VPU broadcast multiply.
    dense_t = wp_ref[...] * price_ref[...] + bp_ref[...]             # [E, TB]

    # ---- full feature slab (cat features then dense feature) ----------------
    feats_t = jnp.concatenate([cat_ref[...], dense_t], axis=0)       # [F*E, TB]

    # ---- pairwise interaction products, (i<j) row-major order ---------------
    prods = []
    for i in range(F):
        for j in range(i + 1, F):
            prods.append(feats_t[i * E:(i + 1) * E, :] *
                         feats_t[j * E:(j + 1) * E, :])
    p_t = jnp.concatenate(prods, axis=0)                             # [NI*E, TB]

    # ---- bottom MLP on the dense embedding -----------------------------------
    h = jnp.dot(wb1_ref[...], dense_t,
                preferred_element_type=jnp.float32) + bb1_ref[...]
    h = jnp.maximum(h, 0.0)                                          # [H1, TB]
    h = jnp.dot(wb2_ref[...], h,
                preferred_element_type=jnp.float32) + bb2_ref[...]
    h = jnp.maximum(h, 0.0)                                          # [H2, TB]

    # ---- top MLP layer 1 ------------------------------------------------------
    # t = relu(wt1[:, :NI] @ interaction + wt1[:, NI:] @ h + bt1); the sum over
    # E inside each interaction is folded into w1p (replicated columns), so the
    # interaction vector / concat is never materialized.
    t = (jnp.dot(w1p_ref[...], p_t, preferred_element_type=jnp.float32)
         + jnp.dot(w1h_ref[...], h, preferred_element_type=jnp.float32)
         + bt1_ref[...])
    t = jnp.maximum(t, 0.0)                                          # [T1, TB]

    # ---- top MLP layer 2 (output dim 1): multiply + sublane reduce -----------
    out_ref[...] = (jnp.sum(t * wt2c_ref[...], axis=0, keepdims=True)
                    + bt2_ref[...])                                  # [1, TB]


def init_params(key, field_dims, embedding_dim=16,
                bottom_mlp_sizes=(64, 32), top_mlp_sizes=(64, 32, 1)):
    """Deterministic synthetic init, PyTorch layout (W: [out, in], b: [out])."""
    dims = [d for d in field_dims.values() if d > 0]
    n_cat = len(dims)
    num_features = n_cat + 1
    num_interactions = num_features * (num_features - 1) // 2
    top_input_dim = num_interactions + bottom_mlp_sizes[-1]

    keys = iter(jax.random.split(key, n_cat + 10))

    emb_tables = [jax.random.normal(next(keys), (d, embedding_dim), jnp.float32)
                  for d in dims]

    def linear(d_in, d_out):
        lim = 1.0 / float(d_in) ** 0.5
        w = jax.random.uniform(next(keys), (d_out, d_in), jnp.float32, -lim, lim)
        b = jax.random.uniform(next(keys), (d_out,), jnp.float32, -lim, lim)
        return w, b

    wp, bp = linear(1, embedding_dim)
    wb1, bb1 = linear(embedding_dim, bottom_mlp_sizes[0])
    wb2, bb2 = linear(bottom_mlp_sizes[0], bottom_mlp_sizes[1])
    # Top MLP per the module __init__: Linear(top_input_dim, 32) -> ReLU -> Linear(32, 1)
    wt1, bt1 = linear(top_input_dim, top_mlp_sizes[1])
    wt2, bt2 = linear(top_mlp_sizes[1], top_mlp_sizes[2])

    return dict(emb_tables=emb_tables, wp=wp, bp=bp, wb1=wb1, bb1=bb1,
                wb2=wb2, bb2=bb2, wt1=wt1, bt1=bt1, wt2=wt2, bt2=bt2)


def dlrm_forward(params, x_cat, price, *, block_b=2048):
    """x_cat: int32 [n_cat, B]; price: f32 [B]  ->  f32 [B].

    block_b: batch tile (lane axis), must be a multiple of 128.
    Guidance: 2048-4096 on v7x (64 MiB VMEM, 2 TCs take the 'parallel' grid),
    4096-8192 on v6e/v5e (raise vmem_limit_bytes accordingly).
    """
    emb_tables = params["emb_tables"]
    n_cat = len(emb_tables)
    E = params["wp"].shape[0]
    H1 = params["wb1"].shape[0]
    H2 = params["wb2"].shape[0]
    T1 = params["wt1"].shape[0]
    NI = (n_cat + 1) * n_cat // 2
    B = price.shape[0]

    # ---- embedding gather (JAX glue), packed as one lane-dense slab ---------
    # TODO(synk): in-kernel gather (scalar prefetch + manual DMA) to halve
    #             embedding HBM traffic and overlap gather with compute.
    cat_t = jnp.concatenate(
        [jnp.take(tbl, x_cat[i], axis=0).T for i, tbl in enumerate(emb_tables)],
        axis=0).astype(jnp.float32)                                  # [n_cat*E, B]
    price_t = price.astype(jnp.float32)[None, :]                     # [1, B]

    # ---- pad batch to a tile multiple, pick the tile -------------------------
    bp128 = ((B + 127) // 128) * 128
    tb = block_b if bp128 >= block_b else bp128
    b_pad = ((bp128 + tb - 1) // tb) * tb
    if b_pad != B:
        cat_t = jnp.pad(cat_t, ((0, 0), (0, b_pad - B)))
        price_t = jnp.pad(price_t, ((0, 0), (0, b_pad - B)))
    grid = (b_pad // tb,)

    # ---- weight prep (PyTorch [out,in] layout; biases as columns) ------------
    w1p = jnp.repeat(params["wt1"][:, :NI], E, axis=1)               # [T1, NI*E]
    w1h = params["wt1"][:, NI:]                                      # [T1, H2]
    weights = [
        params["wp"], params["bp"][:, None],
        params["wb1"], params["bb1"][:, None],
        params["wb2"], params["bb2"][:, None],
        w1p, w1h, params["bt1"][:, None],
        params["wt2"].T, params["bt2"][:, None],
    ]

    def full_spec(a):  # VMEM-resident across grid steps (constant block index)
        return pl.BlockSpec(a.shape, lambda *_: (0,) * a.ndim)

    in_specs = [
        pl.BlockSpec((n_cat * E, tb), lambda i: (0, i)),   # cat slab: batch-tiled
        pl.BlockSpec((1, tb), lambda i: (0, i)),           # price:    batch-tiled
    ] + [full_spec(w) for w in weights]

    out_specs = pl.BlockSpec((1, tb), lambda i: (0, i))    # lane-dense output row

    flops = 2 * b_pad * (E + NI * E + E * H1 + H1 * H2 + NI * E * T1
                         + H2 * T1 + T1)
    bytes_accessed = 4 * (b_pad * (n_cat * E + 2)
                          + sum(int(w.size) for w in weights))

    out = pl.pallas_call(
        partial(dlrm_kernel, n_cat=n_cat, emb_dim=E),
        out_shape=jax.ShapeDtypeStruct((1, b_pad), jnp.float32),
        grid_spec=pltpu.PrefetchScalarGridSpec(
            num_scalar_prefetch=0,
            grid=grid,
            in_specs=in_specs,
            out_specs=out_specs,
        ),
        compiler_params=pltpu.CompilerParams(
            dimension_semantics=("parallel",),
            vmem_limit_bytes=32 * 1024 * 1024,
        ),
        cost_estimate=pl.CostEstimate(
            flops=int(flops), transcendentals=0,
            bytes_accessed=int(bytes_accessed)),
    )(cat_t, price_t, *weights)

    return out[0, :B]


def dlrm_reference(params, x_cat, price):
    """Pure-JAX reference mirroring the PyTorch forward (PyTorch weight layout)."""
    embs = [jnp.take(tbl, x_cat[i], axis=0)
            for i, tbl in enumerate(params["emb_tables"])]
    dense = price[:, None] @ params["wp"].T + params["bp"][None, :]
    feats = embs + [dense]
    inter = []
    for i in range(len(feats)):
        for j in range(i + 1, len(feats)):
            inter.append(jnp.sum(feats[i] * feats[j], axis=1, keepdims=True))
    interaction = jnp.concatenate(inter, axis=1)
    h = jnp.maximum(dense @ params["wb1"].T + params["bb1"][None, :], 0.0)
    h = jnp.maximum(h @ params["wb2"].T + params["bb2"][None, :], 0.0)
    concat = jnp.concatenate([interaction, h], axis=1)
    t = jnp.maximum(concat @ params["wt1"].T + params["bt1"][None, :], 0.0)
    out = t @ params["wt2"].T + params["bt2"][None, :]
    return out[:, 0]


if __name__ == "__main__":
    field_dims = {"user_id": 10, "item_id": 20, "category": 15, "brand": 12}
    embedding_dim = 16
    batch = 8

    key = jax.random.PRNGKey(0)
    kp, kc, kprice = jax.random.split(key, 3)
    params = init_params(kp, field_dims, embedding_dim)

    dims = [d for d in field_dims.values() if d > 0]
    x_cat = jnp.stack(
        [jax.random.randint(jax.random.fold_in(kc, i), (batch,), 0, d)
         for i, d in enumerate(dims)], axis=0).astype(jnp.int32)     # [4, 8]
    price = jax.random.uniform(kprice, (batch,), jnp.float32)        # [8]

    fwd = jax.jit(dlrm_forward)
    out = jax.block_until_ready(fwd(params, x_cat, price))

    ref = dlrm_reference(params, x_cat, price)
    assert out.shape == (batch,)
    assert jnp.allclose(out, ref, atol=1e-4, rtol=1e-4), (out, ref)

    print("KERNEL_OK")
</pallas_src>

<mosaic_0001>
module attributes {stable_mosaic.version = 11 : i64} {
  func.func @dlrm_kernel(%arg0: i32, %arg1: memref<64x128xf32, #tpu.memory_space<vmem>>, %arg2: memref<1x128xf32, #tpu.memory_space<vmem>>, %arg3: memref<16x1xf32, #tpu.memory_space<vmem>>, %arg4: memref<16x1xf32, #tpu.memory_space<vmem>>, %arg5: memref<64x16xf32, #tpu.memory_space<vmem>>, %arg6: memref<64x1xf32, #tpu.memory_space<vmem>>, %arg7: memref<32x64xf32, #tpu.memory_space<vmem>>, %arg8: memref<32x1xf32, #tpu.memory_space<vmem>>, %arg9: memref<32x160xf32, #tpu.memory_space<vmem>>, %arg10: memref<32x32xf32, #tpu.memory_space<vmem>>, %arg11: memref<32x1xf32, #tpu.memory_space<vmem>>, %arg12: memref<32x1xf32, #tpu.memory_space<vmem>>, %arg13: memref<1x1xf32, #tpu.memory_space<vmem>>, %arg14: memref<1x128xf32, #tpu.memory_space<vmem>>) attributes {dimension_semantics = [#tpu.dimension_semantics<parallel>], iteration_bounds = array<i64: 1>, scalar_prefetch = 0 : i64, scratch_operands = 0 : i64, tpu.core_type = #tpu.core_type<tc>, window_params = [{transform_indices = @transform_0, window_bounds = array<i64: 64, 128>}, {transform_indices = @transform_1, window_bounds = array<i64: 1, 128>}, {pipeline_mode = #tpu.pipeline_mode<synchronous>, transform_indices = @transform_2, window_bounds = array<i64: 16, 1>}, {pipeline_mode = #tpu.pipeline_mode<synchronous>, transform_indices = @transform_3, window_bounds = array<i64: 16, 1>}, {pipeline_mode = #tpu.pipeline_mode<synchronous>, transform_indices = @transform_4, window_bounds = array<i64: 64, 16>}, {pipeline_mode = #tpu.pipeline_mode<synchronous>, transform_indices = @transform_5, window_bounds = array<i64: 64, 1>}, {pipeline_mode = #tpu.pipeline_mode<synchronous>, transform_indices = @transform_6, window_bounds = array<i64: 32, 64>}, {pipeline_mode = #tpu.pipeline_mode<synchronous>, transform_indices = @transform_7, window_bounds = array<i64: 32, 1>}, {pipeline_mode = #tpu.pipeline_mode<synchronous>, transform_indices = @transform_8, window_bounds = array<i64: 32, 160>}, {pipeline_mode = #tpu.pipeline_mode<synchronous>, transform_indices = @transform_9, window_bounds = array<i64: 32, 32>}, {pipeline_mode = #tpu.pipeline_mode<synchronous>, transform_indices = @transform_10, window_bounds = array<i64: 32, 1>}, {pipeline_mode = #tpu.pipeline_mode<synchronous>, transform_indices = @transform_11, window_bounds = array<i64: 32, 1>}, {pipeline_mode = #tpu.pipeline_mode<synchronous>, transform_indices = @transform_12, window_bounds = array<i64: 1, 1>}, {transform_indices = @transform_13, window_bounds = array<i64: 1, 128>}]} {
    %c0 = arith.constant 0 : index
    %c0_0 = arith.constant 0 : index
    %0 = vector.load %arg3[%c0, %c0_0] : memref<16x1xf32, #tpu.memory_space<vmem>>, vector<16x1xf32>
    %c0_1 = arith.constant 0 : index
    %c0_2 = arith.constant 0 : index
    %1 = vector.load %arg2[%c0_1, %c0_2] : memref<1x128xf32, #tpu.memory_space<vmem>>, vector<1x128xf32>
    %2 = vector.broadcast %0 : vector<16x1xf32> to vector<16x128xf32>
    %3 = vector.broadcast %1 : vector<1x128xf32> to vector<16x128xf32>
    %4 = arith.mulf %2, %3 : vector<16x128xf32>
    %c0_3 = arith.constant 0 : index
    %c0_4 = arith.constant 0 : index
    %5 = vector.load %arg4[%c0_3, %c0_4] : memref<16x1xf32, #tpu.memory_space<vmem>>, vector<16x1xf32>
    %6 = vector.broadcast %5 : vector<16x1xf32> to vector<16x128xf32>
    %7 = arith.addf %4, %6 : vector<16x128xf32>
    %c0_5 = arith.constant 0 : index
    %c0_6 = arith.constant 0 : index
    %8 = vector.load %arg1[%c0_5, %c0_6] : memref<64x128xf32, #tpu.memory_space<vmem>>, vector<64x128xf32>
    %9 = tpu.concatenate %8, %7 in 0 : vector<64x128xf32>, vector<16x128xf32> -> vector<80x128xf32>
    %10 = vector.extract_strided_slice %9 {offsets = [0, 0], sizes = [16, 128], strides = [1, 1]} : vector<80x128xf32> to vector<16x128xf32>
    %11 = vector.extract_strided_slice %9 {offsets = [16, 0], sizes = [16, 128], strides = [1, 1]} : vector<80x128xf32> to vector<16x128xf32>
    %12 = arith.mulf %10, %11 : vector<16x128xf32>
    %13 = vector.extract_strided_slice %9 {offsets = [0, 0], sizes = [16, 128], strides = [1, 1]} : vector<80x128xf32> to vector<16x128xf32>
    %14 = vector.extract_strided_slice %9 {offsets = [32, 0], sizes = [16, 128], strides = [1, 1]} : vector<80x128xf32> to vector<16x128xf32>
    %15 = arith.mulf %13, %14 : vector<16x128xf32>
    %16 = vector.extract_strided_slice %9 {offsets = [0, 0], sizes = [16, 128], strides = [1, 1]} : vector<80x128xf32> to vector<16x128xf32>
    %17 = vector.extract_strided_slice %9 {offsets = [48, 0], sizes = [16, 128], strides = [1, 1]} : vector<80x128xf32> to vector<16x128xf32>
    %18 = arith.mulf %16, %17 : vector<16x128xf32>
    %19 = vector.extract_strided_slice %9 {offsets = [0, 0], sizes = [16, 128], strides = [1, 1]} : vector<80x128xf32> to vector<16x128xf32>
    %20 = vector.extract_strided_slice %9 {offsets = [64, 0], sizes = [16, 128], strides = [1, 1]} : vector<80x128xf32> to vector<16x128xf32>
    %21 = arith.mulf %19, %20 : vector<16x128xf32>
    %22 = vector.extract_strided_slice %9 {offsets = [16, 0], sizes = [16, 128], strides = [1, 1]} : vector<80x128xf32> to vector<16x128xf32>
    %23 = vector.extract_strided_slice %9 {offsets = [32, 0], sizes = [16, 128], strides = [1, 1]} : vector<80x128xf32> to vector<16x128xf32>
    %24 = arith.mulf %22, %23 : vector<16x128xf32>
    %25 = vector.extract_strided_slice %9 {offsets = [16, 0], sizes = [16, 128], strides = [1, 1]} : vector<80x128xf32> to vector<16x128xf32>
    %26 = vector.extract_strided_slice %9 {offsets = [48, 0], sizes = [16, 128], strides = [1, 1]} : vector<80x128xf32> to vector<16x128xf32>
    %27 = arith.mulf %25, %26 : vector<16x128xf32>
    %28 = vector.extract_strided_slice %9 {offsets = [16, 0], sizes = [16, 128], strides = [1, 1]} : vector<80x128xf32> to vector<16x128xf32>
    %29 = vector.extract_strided_slice %9 {offsets = [64, 0], sizes = [16, 128], strides = [1, 1]} : vector<80x128xf32> to vector<16x128xf32>
    %30 = arith.mulf %28, %29 : vector<16x128xf32>
    %31 = vector.extract_strided_slice %9 {offsets = [32, 0], sizes = [16, 128], strides = [1, 1]} : vector<80x128xf32> to vector<16x128xf32>
    %32 = vector.extract_strided_slice %9 {offsets = [48, 0], sizes = [16, 128], strides = [1, 1]} : vector<80x128xf32> to vector<16x128xf32>
    %33 = arith.mulf %31, %32 : vector<16x128xf32>
    %34 = vector.extract_strided_slice %9 {offsets = [32, 0], sizes = [16, 128], strides = [1, 1]} : vector<80x128xf32> to vector<16x128xf32>
    %35 = vector.extract_strided_slice %9 {offsets = [64, 0], sizes = [16, 128], strides = [1, 1]} : vector<80x128xf32> to vector<16x128xf32>
    %36 = arith.mulf %34, %35 : vector<16x128xf32>
    %37 = vector.extract_strided_slice %9 {offsets = [48, 0], sizes = [16, 128], strides = [1, 1]} : vector<80x128xf32> to vector<16x128xf32>
    %38 = vector.extract_strided_slice %9 {offsets = [64, 0], sizes = [16, 128], strides = [1, 1]} : vector<80x128xf32> to vector<16x128xf32>
    %39 = arith.mulf %37, %38 : vector<16x128xf32>
    %40 = tpu.concatenate %12, %15, %18, %21, %24, %27, %30, %33, %36, %39 in 0 : vector<16x128xf32>, vector<16x128xf32>, vector<16x128xf32>, vector<16x128xf32>, vector<16x128xf32>, vector<16x128xf32>, vector<16x128xf32>, vector<16x128xf32>, vector<16x128xf32>, vector<16x128xf32> -> vector<160x128xf32>
    %c0_7 = arith.constant 0 : index
    %c0_8 = arith.constant 0 : index
    %41 = vector.load %arg5[%c0_7, %c0_8] : memref<64x16xf32, #tpu.memory_space<vmem>>, vector<64x16xf32>
    %cst = arith.constant dense<0.000000e+00> : vector<64x128xf32>
    %42 = tpu.matmul %41, %7, %cst {dimension_numbers = #tpu.dot_dimension_numbers<[1], [0], [0], [1], [0, 0, 1, 1], [], []>} : vector<64x16xf32>, vector<16x128xf32>, vector<64x128xf32> -> vector<64x128xf32>
    %c0_9 = arith.constant 0 : index
    %c0_10 = arith.constant 0 : index
    %43 = vector.load %arg6[%c0_9, %c0_10] : memref<64x1xf32, #tpu.memory_space<vmem>>, vector<64x1xf32>
    %44 = vector.broadcast %43 : vector<64x1xf32> to vector<64x128xf32>
    %45 = arith.addf %42, %44 : vector<64x128xf32>
    %cst_11 = arith.constant 0.000000e+00 : f32
    %46 = vector.broadcast %cst_11 : f32 to vector<64x128xf32>
    %47 = arith.maximumf %45, %46 : vector<64x128xf32>
    %c0_12 = arith.constant 0 : index
    %c0_13 = arith.constant 0 : index
    %48 = vector.load %arg7[%c0_12, %c0_13] : memref<32x64xf32, #tpu.memory_space<vmem>>, vector<32x64xf32>
    %cst_14 = arith.constant dense<0.000000e+00> : vector<32x128xf32>
    %49 = tpu.matmul %48, %47, %cst_14 {dimension_numbers = #tpu.dot_dimension_numbers<[1], [0], [0], [1], [0, 0, 1, 1], [], []>} : vector<32x64xf32>, vector<64x128xf32>, vector<32x128xf32> -> vector<32x128xf32>
    %c0_15 = arith.constant 0 : index
    %c0_16 = arith.constant 0 : index
    %50 = vector.load %arg8[%c0_15, %c0_16] : memref<32x1xf32, #tpu.memory_space<vmem>>, vector<32x1xf32>
    %51 = vector.broadcast %50 : vector<32x1xf32> to vector<32x128xf32>
    %52 = arith.addf %49, %51 : vector<32x128xf32>
    %cst_17 = arith.constant 0.000000e+00 : f32
    %53 = vector.broadcast %cst_17 : f32 to vector<32x128xf32>
    %54 = arith.maximumf %52, %53 : vector<32x128xf32>
    %c0_18 = arith.constant 0 : index
    %c0_19 = arith.constant 0 : index
    %55 = vector.load %arg9[%c0_18, %c0_19] : memref<32x160xf32, #tpu.memory_space<vmem>>, vector<32x160xf32>
    %cst_20 = arith.constant dense<0.000000e+00> : vector<32x128xf32>
    %56 = tpu.matmul %55, %40, %cst_20 {dimension_numbers = #tpu.dot_dimension_numbers<[1], [0], [0], [1], [0, 0, 1, 1], [], []>} : vector<32x160xf32>, vector<160x128xf32>, vector<32x128xf32> -> vector<32x128xf32>
    %c0_21 = arith.constant 0 : index
    %c0_22 = arith.constant 0 : index
    %57 = vector.load %arg10[%c0_21, %c0_22] : memref<32x32xf32, #tpu.memory_space<vmem>>, vector<32x32xf32>
    %cst_23 = arith.constant dense<0.000000e+00> : vector<32x128xf32>
    %58 = tpu.matmul %57, %54, %cst_23 {dimension_numbers = #tpu.dot_dimension_numbers<[1], [0], [0], [1], [0, 0, 1, 1], [], []>} : vector<32x32xf32>, vector<32x128xf32>, vector<32x128xf32> -> vector<32x128xf32>
    %59 = arith.addf %56, %58 : vector<32x128xf32>
    %c0_24 = arith.constant 0 : index
    %c0_25 = arith.constant 0 : index
    %60 = vector.load %arg11[%c0_24, %c0_25] : memref<32x1xf32, #tpu.memory_space<vmem>>, vector<32x1xf32>
    %61 = vector.broadcast %60 : vector<32x1xf32> to vector<32x128xf32>
    %62 = arith.addf %59, %61 : vector<32x128xf32>
    %cst_26 = arith.constant 0.000000e+00 : f32
    %63 = vector.broadcast %cst_26 : f32 to vector<32x128xf32>
    %64 = arith.maximumf %62, %63 : vector<32x128xf32>
    %c0_27 = arith.constant 0 : index
    %c0_28 = arith.constant 0 : index
    %65 = vector.load %arg12[%c0_27, %c0_28] : memref<32x1xf32, #tpu.memory_space<vmem>>, vector<32x1xf32>
    %66 = vector.broadcast %65 : vector<32x1xf32> to vector<32x128xf32>
    %67 = arith.mulf %64, %66 : vector<32x128xf32>
    %cst_29 = arith.constant dense<0.000000e+00> : vector<128xf32>
    %68 = vector.multi_reduction <add>, %67, %cst_29 [0] : vector<32x128xf32> to vector<128xf32>
    %69 = vector.shape_cast %68 : vector<128xf32> to vector<1x128xf32>
    %c0_30 = arith.constant 0 : index
    %c0_31 = arith.constant 0 : index
    %70 = vector.load %arg13[%c0_30, %c0_31] : memref<1x1xf32, #tpu.memory_space<vmem>>, vector<1x1xf32>
    %71 = vector.broadcast %70 : vector<1x1xf32> to vector<1x128xf32>
    %72 = arith.addf %69, %71 : vector<1x128xf32>
    %c0_32 = arith.constant 0 : index
    %c0_33 = arith.constant 0 : index
    %73 = vector.load %arg14[%c0_32, %c0_33] : memref<1x128xf32, #tpu.memory_space<vmem>>, vector<1x128xf32>
    tpu.vector_store %arg14[%c0_32, %c0_33], %72 {strides = array<i32>} : memref<1x128xf32, #tpu.memory_space<vmem>>, vector<1x128xf32>,
    return
  }
  func.func @transform_0(%arg0: i32) -> (i32, i32) {
    %c0_i32 = arith.constant 0 : i32
    %c0_i32_0 = arith.constant 0 : i32
    return %c0_i32, %arg0 : i32, i32
  }
  func.func @transform_1(%arg0: i32) -> (i32, i32) {
    %c0_i32 = arith.constant 0 : i32
    %c0_i32_0 = arith.constant 0 : i32
    return %c0_i32, %arg0 : i32, i32
  }
  func.func @transform_2(%arg0: i32) -> (i32, i32) {
    %c0_i32 = arith.constant 0 : i32
    %c0_i32_0 = arith.constant 0 : i32
    %c0_i32_1 = arith.constant 0 : i32
    return %c0_i32, %c0_i32_0 : i32, i32
  }
  func.func @transform_3(%arg0: i32) -> (i32, i32) {
    %c0_i32 = arith.constant 0 : i32
    %c0_i32_0 = arith.constant 0 : i32
    %c0_i32_1 = arith.constant 0 : i32
    return %c0_i32, %c0_i32_0 : i32, i32
  }
  func.func @transform_4(%arg0: i32) -> (i32, i32) {
    %c0_i32 = arith.constant 0 : i32
    %c0_i32_0 = arith.constant 0 : i32
    %c0_i32_1 = arith.constant 0 : i32
    return %c0_i32, %c0_i32_0 : i32, i32
  }
  func.func @transform_5(%arg0: i32) -> (i32, i32) {
    %c0_i32 = arith.constant 0 : i32
    %c0_i32_0 = arith.constant 0 : i32
    %c0_i32_1 = arith.constant 0 : i32
    return %c0_i32, %c0_i32_0 : i32, i32
  }
  func.func @transform_6(%arg0: i32) -> (i32, i32) {
    %c0_i32 = arith.constant 0 : i32
    %c0_i32_0 = arith.constant 0 : i32
    %c0_i32_1 = arith.constant 0 : i32
    return %c0_i32, %c0_i32_0 : i32, i32
  }
  func.func @transform_7(%arg0: i32) -> (i32, i32) {
    %c0_i32 = arith.constant 0 : i32
    %c0_i32_0 = arith.constant 0 : i32
    %c0_i32_1 = arith.constant 0 : i32
    return %c0_i32, %c0_i32_0 : i32, i32
  }
  func.func @transform_8(%arg0: i32) -> (i32, i32) {
    %c0_i32 = arith.constant 0 : i32
    %c0_i32_0 = arith.constant 0 : i32
    %c0_i32_1 = arith.constant 0 : i32
    return %c0_i32, %c0_i32_0 : i32, i32
  }
  func.func @transform_9(%arg0: i32) -> (i32, i32) {
    %c0_i32 = arith.constant 0 : i32
    %c0_i32_0 = arith.constant 0 : i32
    %c0_i32_1 = arith.constant 0 : i32
    return %c0_i32, %c0_i32_0 : i32, i32
  }
  func.func @transform_10(%arg0: i32) -> (i32, i32) {
    %c0_i32 = arith.constant 0 : i32
    %c0_i32_0 = arith.constant 0 : i32
    %c0_i32_1 = arith.constant 0 : i32
    return %c0_i32, %c0_i32_0 : i32, i32
  }
  func.func @transform_11(%arg0: i32) -> (i32, i32) {
    %c0_i32 = arith.constant 0 : i32
    %c0_i32_0 = arith.constant 0 : i32
    %c0_i32_1 = arith.constant 0 : i32
    return %c0_i32, %c0_i32_0 : i32, i32
  }
  func.func @transform_12(%arg0: i32) -> (i32, i32) {
    %c0_i32 = arith.constant 0 : i32
    %c0_i32_0 = arith.constant 0 : i32
    %c0_i32_1 = arith.constant 0 : i32
    return %c0_i32, %c0_i32_0 : i32, i32
  }
  func.func @transform_13(%arg0: i32) -> (i32, i32) {
    %c0_i32 = arith.constant 0 : i32
    %c0_i32_0 = arith.constant 0 : i32
    return %c0_i32, %arg0 : i32, i32
  }
}

</mosaic_0001>

<bundles_post_ra>
// kernel: dlrm_forward.1
= control target key start
LH: loop header
LB: loop body
LE: loop exit
PB: predicated region body
PF: predicated region fallthrough
CT: control target
= control target key end

     0   :  { %v545_v0 = vmov 0   ;;  %vm162_vm0 = vcmask 130048   ;;  %vm264_vm1 = vcmask 523264   ;;  %vm322_vm2 = vcmask 261120   ;;  %s871_s3 = inlined_call_operand.vmem [shape: f32[16,1], index: 3, kind: input, shape index: {}]   ;;  %s872_s2 = inlined_call_operand.vmem [shape: f32[16,1], index: 2, kind: input, shape index: {}]   ;;  %s873_s1 = inlined_call_operand.vmem [shape: f32[1,128], index: 1, kind: input, shape index: {}]   ;;  %s874_s5 = inlined_call_operand.vmem [shape: f32[64,1], index: 5, kind: input, shape index: {}]   ;;  %s875_s12 = inlined_call_operand.<no memory space> [shape: f32[1,1], index: 12, kind: input, shape index: {}]   ;;  %s876_s7 = inlined_call_operand.vmem [shape: f32[32,1], index: 7, kind: input, shape index: {}]   ;;  %s877_s10 = inlined_call_operand.vmem [shape: f32[32,1], index: 10, kind: input, shape index: {}]   ;;  %s878_s11 = inlined_call_operand.vmem [shape: f32[32,1], index: 11, kind: input, shape index: {}]   ;;  %s879_s0 = inlined_call_operand.vmem [shape: f32[64,128], index: 0, kind: input, shape index: {}]   ;;  %s880_s4 = inlined_call_operand.vmem [shape: f32[64,16], index: 4, kind: input, shape index: {}]   ;;  %s881_s6 = inlined_call_operand.vmem [shape: f32[32,64], index: 6, kind: input, shape index: {}]   ;;  %s882_s8 = inlined_call_operand.vmem [shape: f32[32,160], index: 8, kind: input, shape index: {}]   ;;  %s883_s9 = inlined_call_operand.vmem [shape: f32[32,32], index: 9, kind: input, shape index: {}]   ;;  %s884_s13 = inlined_call_operand.vmem [shape: f32[1,128], index: 13, kind: output, shape index: {}]  }
   0x1   :  { %542 = vset.pattern.permute.xlu1 %v545_v0  ;;  %541 = vset.pattern.permute.xlu0 %v545_v0  ;;  %v65_v1 = vld [vmem:[%s871_s3 + $0x8] sm:$0xff]  ;;  %v64_v3 = vld [vmem:[%s871_s3] sm:$0xff]  ;;  %v116_v8 = vld [vmem:[%s874_s5 + $0x10] sm:$0xff]  ;;  %v18_v9 = vstv %s875_s12 }
   0x2   :  { %v47_v2 = vld [vmem:[%s872_s2 + $0x8] sm:$0xff]  ;;  %73 = vperm.xlu1 %542, %v65_v1   ;;  %543 = vset.pattern.permute.xlu2 %v545_v0  ;;  %v46_v4 = vld [vmem:[%s872_s2] sm:$0xff]  ;;  %19 = vst [vmem:[#allocation2] sm:$0x1] %v18_v9  ;;  %v242_v10 = vld [vmem:[%s876_s7 + $0x10] sm:$0xff] }
   0x3   :  { %56 = vperm.xlu0 %541, %v47_v2   ;;  %v118_v5 = vld [vmem:[%s874_s5 + $0x20] sm:$0xff]  ;;  %v119_v6 = vld [vmem:[%s874_s5 + $0x28] sm:$0xff]  ;;  %v243_v11 = vld [vmem:[%s876_s7 + $0x18] sm:$0xff] }
   0x4   :  { %v115_v7 = vld [vmem:[%s874_s5 + $0x8] sm:$0xff]  ;;  %v434_v12 = vld [vmem:[%s877_s10] sm:$0xff]  ;;  %v437_v14 = vld [vmem:[%s877_s10 + $0x18] sm:$0xff] }
   0x5   :  { %v240_v13 = vld [vmem:[%s876_s7] sm:$0xff]  ;;  %v436_v15 = vld [vmem:[%s877_s10 + $0x10] sm:$0xff]  ;;  %v467_v17 = vld [vmem:[%s878_s11 + $0x8] sm:$0xff] }
   0x6   :  { %v468_v16 = vld [vmem:[%s878_s11 + $0x10] sm:$0xff]  ;;  %v670_v19 = vld [vmem:[%s879_s0 + $0x28] sm:$0xff]  ;;  %v675_v20 = vld [vmem:[%s879_s0 + $0x38] sm:$0xff] }
   0x7   :  { %v101_v21 = vmul.f32 %v675_v20, %v670_v19  ;;  %v682_v22 = vld [vmem:[%s879_s0 + $0x20] sm:$0xff]  ;;  %v687_v23 = vld [vmem:[%s879_s0 + $0x30] sm:$0xff]  ;;  %v121_v25 = vld [vmem:[%s874_s5 + $0x38] sm:$0xff] }
   0x8   :  { %v100_v24 = vmul.f32 %v687_v23, %v682_v22  ;;  %159 = vperm.xlu2 %543, %v121_v25   ;;  %v544_v26 = vld [vmem:[%s873_s1] ss:$0 sm:$0xff]  ;;  %v120_v29 = vld [vmem:[%s874_s5 + $0x30] sm:$0xff]  ;;  %v703_v31 = vld [vmem:[%s879_s0 + $0x18] sm:$0xff] }
   0x9   :  { %v503_v18 = vld [vmem:[#allocation2] sm:$0x1]  ;;  %376 = vmatpush.msra.mxu3 %v101_v21  ;;  %v117_v35 = vld [vmem:[%s874_s5 + $0x18] sm:$0xff]  ;;  %v716_v38 = vld [vmem:[%s879_s0 + $0x10] sm:$0xff]  ;;  %v97_v42 = vmul.f32 %v675_v20, %v703_v31  ;;  %v95_v45 = vmul.f32 %v670_v19, %v703_v31 }
   0xa   :  { %68 = vperm.xlu1 %542, %v64_v3   ;;  %v106_v40 = vld [vmem:[%s880_s4] sm:$0xff]  ;;  %v96_v43 = vmul.f32 %v687_v23, %v716_v38  ;;  %v107_v46 = vld [vmem:[%s880_s4 + $0x8] sm:$0xff]  ;;  %v94_v47 = vmul.f32 %v682_v22, %v716_v38  ;;  %v108_v52 = vld [vmem:[%s880_s4 + $0x10] sm:$0xff] }
   0xb   :  { %51 = vperm.xlu0 %541, %v46_v4   ;;  %377 = vmatpush.msra.mxu3 %v100_v24  ;;  %v114_v44 = vld [vmem:[%s874_s5] sm:$0xff]  ;;  %v744_v48 = vld [vmem:[%s879_s0 + $0x8] sm:$0xff]  ;;  %v109_v53 = vld [vmem:[%s880_s4 + $0x18] sm:$0xff] }
   0xc   :  { %v750_v49 = vld [vmem:[%s879_s0] sm:$0xff]  ;;  %v241_v54 = vld [vmem:[%s876_s7 + $0x8] sm:$0xff]  ;;  %v112_v59 = vld [vmem:[%s880_s4 + $0x30] sm:$0xff] }
   0xd   :  { %v110_v55 = vld [vmem:[%s880_s4 + $0x20] sm:$0xff]  ;;  %v435_v56 = vld [vmem:[%s877_s10 + $0x8] sm:$0xff]  ;;  %v469_v60 = vld [vmem:[%s878_s11 + $0x18] sm:$0xff] }
   0xe   :  { %v111_v57 = vld [vmem:[%s880_s4 + $0x28] sm:$0xff]  ;;  %v466_v58 = vld [vmem:[%s878_s11] sm:$0xff]  ;;  %v113_v61 = vld [vmem:[%s880_s4 + $0x38] sm:$0xff] }
  0x10   :  { %154 = vperm.xlu2 %543, %v120_v29  }
  0x12   :  { %144 = vperm.xlu1 %542, %v118_v5  }
  0x13   :  { %149 = vperm.xlu0 %541, %v119_v6  }
  0x18   :  { %139 = vperm.xlu2 %543, %v117_v35  }
  0x1a   :  { %129 = vperm.xlu1 %542, %v115_v7  }
  0x1b   :  { %134 = vperm.xlu0 %541, %v116_v8  }
  0x20   :  { %124 = vperm.xlu2 %543, %v114_v44   ;;  %v89_v44 = vmul.f32 %v670_v19, %v744_v48 }
  0x22   :  { %256 = vperm.xlu1 %542, %v242_v10  }
  0x23   :  { %261 = vperm.xlu0 %541, %v243_v11  }
  0x28   :  { %251 = vperm.xlu2 %543, %v241_v54  }
  0x2a   :  { %440 = vperm.xlu1 %542, %v434_v12  }
  0x2b   :  { %246 = vperm.xlu0 %541, %v240_v13  }
  0x30   :  { %445 = vperm.xlu2 %543, %v435_v56  }
  0x32   :  { %455 = vperm.xlu1 %542, %v437_v14  }
  0x33   :  { %450 = vperm.xlu0 %541, %v436_v15  }
  0x38   :  { %472 = vperm.xlu2 %543, %v466_v58  }
  0x3a   :  { %482 = vperm.xlu1 %542, %v468_v16  }
  0x3b   :  { %477 = vperm.xlu0 %541, %v467_v17  }
  0x40   :  { %487 = vperm.xlu2 %543, %v469_v60  }
  0x43   :  { %506 = vperm.xlu0 %541, %v503_v18  }
  0x62   :  { %v160_v3 = vpop.permute.xlu2 %159 }
  0x6a   :  { %v155_v5 = vpop.permute.xlu2 %154 }
  0x72   :  { %v140_v9 = vpop.permute.xlu2 %139 }
  0x74   :  { %v74_v27 = vpop.permute.xlu1 %73 }
  0x75   :  { %v57_v28 = vpop.permute.xlu0 %56 }
  0x76   :  { %v63_v30 = vmul.f32 %v544_v26, %v57_v28 }
  0x78   :  { %v705_v32 = vadd.f32 %v74_v27, %v63_v30 }
  0x7a   :  { %201 = vmatpush.msra.mxu0 %v705_v32  ;;  %v99_v33 = vmul.f32 %v703_v31, %v705_v32  ;;  %v93_v50 = vmul.f32 %v744_v48, %v705_v32  ;;  %v125_v27 = vpop.permute.xlu2 %124 }
  0x7c   :  { %378 = vmatpush.msra.mxu3 %v99_v33  ;;  %v69_v37 = vpop.permute.xlu1 %68 }
  0x7d   :  { %v52_v34 = vpop.permute.xlu0 %51 }
  0x7e   :  { %v62_v36 = vmul.f32 %v544_v26, %v52_v34 }
  0x80   :  { %v718_v39 = vadd.f32 %v69_v37, %v62_v36  ;;  %v236_v36 = vld [vmem:[%s881_s6] sm:$0xff]  ;;  %v237_v37 = vld [vmem:[%s881_s6 + $0x8] sm:$0xff] }
  0x82   :  { %202 = vmatpush.msra.mxu0 %v718_v39  ;;  %v98_v41 = vmul.f32 %v716_v38, %v718_v39  ;;  %v92_v51 = vmul.f32 %v750_v49, %v718_v39  ;;  %v252_v58 = vpop.permute.xlu2 %251 }
  0x83   :  { %516 = vmatmul.msk.f32.vlgmr.msra.gmra.mxu0 %vm162_vm0, %v106_v40  ;;  %v238_v40 = vld [vmem:[%s881_s6 + $0x10] sm:$0xff] }
  0x84   :  { %379 = vmatpush.msra.mxu3 %v98_v41  ;;  %v145_v8 = vpop.permute.xlu1 %144  ;;  %v239_v41 = vld [vmem:[%s881_s6 + $0x18] sm:$0xff] }
  0x85   :  { %v150_v7 = vpop.permute.xlu0 %149 }
  0x86   :  { %380 = vmatpush.msra.mxu3 %v97_v42  ;;  %v91_v42 = vmul.f32 %v675_v20, %v744_v48 }
  0x88   :  { %381 = vmatpush.msra.mxu3 %v96_v43  ;;  %v90_v43 = vmul.f32 %v687_v23, %v750_v49 }
  0x8a   :  { %382 = vmatpush.msra.mxu3 %v95_v45  ;;  %v88_v45 = vmul.f32 %v682_v22, %v750_v49 }
  0x8b   :  { %517 = vmatmul.msk.f32.gmra.mxu0 %vm162_vm0, %v107_v46  ;;  %v87_v46 = vmul.f32 %v703_v31, %v744_v48  ;;  %v314_v31 = vld [vmem:[%s882_s8 + $0x20] sm:$0xff] }
  0x8c   :  { %383 = vmatpush.msra.mxu3 %v94_v47  ;;  %v130_v26 = vpop.permute.xlu1 %129  ;;  %v86_v47 = vmul.f32 %v716_v38, %v750_v49  ;;  %v316_v49 = vld [vmem:[%s882_s8 + $0x30] sm:$0xff] }
  0x8d   :  { %v135_v21 = vpop.permute.xlu0 %134 }
  0x8e   :  { %384 = vmatpush.msra.mxu3 %v93_v50  ;;  %v310_v50 = vld [vmem:[%s882_s8] sm:$0xff] }
  0x90   :  { %385 = vmatpush.msra.mxu3 %v92_v51 }
  0x92   :  { %386 = vmatpush.msra.mxu3 %v91_v42 }
  0x93   :  { %518 = vmatmul.msk.f32.gmra.mxu0 %vm162_vm0, %v108_v52  ;;  %v312_v52 = vld [vmem:[%s882_s8 + $0x10] sm:$0xff] }
  0x94   :  { %387 = vmatpush.msra.mxu3 %v90_v43  ;;  %v257_v54 = vpop.permute.xlu1 %256 }
  0x95   :  { %v262_v38 = vpop.permute.xlu0 %261 }
  0x96   :  { %388 = vmatpush.msra.mxu3 %v89_v44 }
  0x98   :  { %389 = vmatpush.msra.mxu3 %v88_v45 }
  0x9a   :  { %390 = vmatpush.msra.mxu3 %v87_v46 }
  0x9b   :  { %519 = vmatmul.msk.f32.gmra.mxu0 %vm162_vm0, %v109_v53 }
  0x9c   :  { %391 = vmatpush.msra.mxu3 %v86_v47 }
  0x9d   :  { %392 = vmatmul.f32.vlgmr.msra.gmra.mxu3 %v310_v50 }
  0xa3   :  { %520 = vmatmul.msk.f32.gmra.mxu0 %vm162_vm0, %v110_v55 }
  0xa5   :  { %395 = vmatmul.f32.gmra.mxu3 %v312_v52 }
  0xab   :  { %521 = vmatmul.msk.f32.gmra.mxu0 %vm162_vm0, %v111_v57 }
  0xad   :  { %398 = vmatmul.f32.gmra.mxu3 %v314_v31 }
  0xb3   :  { %522 = vmatmul.msk.f32.gmra.mxu0 %vm162_vm0, %v112_v59 }
  0xb5   :  { %401 = vmatmul.f32.gmra.mxu3 %v316_v49 }
  0xbb   :  { %523 = vmatmul.msk.f32.gmra.mxu0 %vm162_vm0, %v113_v61  ;;  %v247_v61 = vpop.permute.xlu0 %246 }
 0x100   :  { %v204_v62 = vpop.f32.mrf.mxu0 }
 0x101   :  { %v205_v30 = vadd.f32 %v204_v62, %v125_v27 }
 0x103   :  { %v228_v35 = vmax.f32 %v205_v30, 0.0 }
 0x108   :  { %v207_v63 = vpop.f32.mrf.mxu0 }
 0x109   :  { %v208_v28 = vadd.f32 %v207_v63, %v130_v26  ;;  %v451_v26 = vpop.permute.xlu0 %450 }
 0x10b   :  { %v229_v34 = vmax.f32 %v208_v28, 0.0 }
 0x110   :  { %v210_v0 = vpop.f32.mrf.mxu0 }
 0x111   :  { %v211_v24 = vadd.f32 %v210_v0, %v135_v21  ;;  %v478_v45 = vpop.permute.xlu0 %477 }
 0x113   :  { %v230_v33 = vmax.f32 %v211_v24, 0.0 }
 0x118   :  { %v213_v1 = vpop.f32.mrf.mxu0 }
 0x119   :  { %v214_v17 = vadd.f32 %v213_v1, %v140_v9 }
 0x11b   :  { %v231_v29 = vmax.f32 %v214_v17, 0.0  ;;  %v446_v17 = vpop.permute.xlu2 %445 }
 0x120   :  { %v216_v2 = vpop.f32.mrf.mxu0 }
 0x121   :  { %v217_v15 = vadd.f32 %v216_v2, %v145_v8  ;;  %v319_v2 = vld [vmem:[%s883_s9 + $0x8] sm:$0xff]  ;;  %v321_v8 = vld [vmem:[%s883_s9 + $0x18] sm:$0xff] }
 0x123   :  { %v232_v25 = vmax.f32 %v217_v15, 0.0 }
 0x128   :  { %v219_v4 = vpop.f32.mrf.mxu0 }
 0x129   :  { %v220_v13 = vadd.f32 %v219_v4, %v150_v7  ;;  %v105_v4 = vmul.f32 %v675_v20, %v705_v32  ;;  %v102_v7 = vmul.f32 %v682_v22, %v718_v39  ;;  %v320_v20 = vld [vmem:[%s883_s9 + $0x10] sm:$0xff]  ;;  %v313_v22 = vld [vmem:[%s882_s8 + $0x18] sm:$0xff] }
 0x12b   :  { %v233_v18 = vmax.f32 %v220_v13, 0.0 }
 0x130   :  { %v222_v6 = vpop.f32.mrf.mxu0 }
 0x131   :  { %v223_v11 = vadd.f32 %v222_v6, %v155_v5  ;;  %v104_v5 = vmul.f32 %v687_v23, %v718_v39  ;;  %v103_v6 = vmul.f32 %v670_v19, %v705_v32  ;;  %v311_v19 = vld [vmem:[%s882_s8 + $0x8] sm:$0xff]  ;;  %v317_v32 = vld [vmem:[%s882_s8 + $0x38] sm:$0xff] }
 0x132   :  { %v315_v23 = vld [vmem:[%s882_s8 + $0x28] sm:$0xff] }
 0x133   :  { %v234_v16 = vmax.f32 %v223_v11, 0.0 }
 0x138   :  { %v225_v10 = vpop.f32.mrf.mxu0 }
 0x139   :  { %v226_v12 = vadd.f32 %v225_v10, %v160_v3  ;;  %v318_v3 = vld [vmem:[%s883_s9] sm:$0xff]  ;;  %v393_v10 = vpop.f32.mrf.mxu3 }
 0x13b   :  { %v235_v14 = vmax.f32 %v226_v12, 0.0 }
 0x13d   :  { %285 = vmatpush.msra.mxu1 %v235_v14  ;;  %v441_v14 = vpop.permute.xlu1 %440 }
 0x13f   :  { %286 = vmatpush.msra.mxu1 %v234_v16 }
 0x141   :  { %287 = vmatpush.msra.mxu1 %v233_v18  ;;  %v396_v12 = vpop.f32.mrf.mxu3 }
 0x143   :  { %288 = vmatpush.msra.mxu1 %v232_v25 }
 0x145   :  { %289 = vmatpush.msra.mxu1 %v231_v29  ;;  %v456_v29 = vpop.permute.xlu1 %455 }
 0x147   :  { %290 = vmatpush.msra.mxu1 %v230_v33 }
 0x149   :  { %291 = vmatpush.msra.mxu1 %v229_v34  ;;  %v399_v18 = vpop.f32.mrf.mxu3 }
 0x14b   :  { %292 = vmatpush.msra.mxu1 %v228_v35 }
 0x14c   :  { %524 = vmatmul.msk.f32.vlgmr.msra.gmra.mxu1 %vm264_vm1, %v236_v36 }
 0x154   :  { %525 = vmatmul.msk.f32.gmra.mxu1 %vm264_vm1, %v237_v37  ;;  %v473_v37 = vpop.permute.xlu2 %472 }
 0x15c   :  { %526 = vmatmul.msk.f32.gmra.mxu1 %vm264_vm1, %v238_v40  ;;  %v402_v40 = vpop.f32.mrf.mxu3  ;;  %v488_v49 = vpop.permute.xlu2 %487 }
 0x164   :  { %527 = vmatmul.msk.f32.gmra.mxu1 %vm264_vm1, %v239_v41 }
 0x1c9   :  { %v294_v51 = vpop.f32.mrf.mxu1 }
 0x1ca   :  { %v295_v62 = vadd.f32 %v294_v51, %v247_v61  ;;  %v483_v51 = vpop.permute.xlu1 %482  ;;  %v507_v61 = vpop.permute.xlu0 %506 }
 0x1cc   :  { %v306_v1 = vmax.f32 %v295_v62, 0.0 }
 0x1d1   :  { %v297_v53 = vpop.f32.mrf.mxu1 }
 0x1d2   :  { %v298_v59 = vadd.f32 %v297_v53, %v252_v58 }
 0x1d4   :  { %v307_v0 = vmax.f32 %v298_v59, 0.0 }
 0x1d9   :  { %v300_v48 = vpop.f32.mrf.mxu1 }
 0x1da   :  { %v301_v56 = vadd.f32 %v300_v48, %v257_v54 }
 0x1dc   :  { %v308_v63 = vmax.f32 %v301_v56, 0.0 }
 0x1e1   :  { %v303_v55 = vpop.f32.mrf.mxu1 }
 0x1e2   :  { %v304_v57 = vadd.f32 %v303_v55, %v262_v38 }
 0x1e4   :  { %v309_v60 = vmax.f32 %v304_v57, 0.0 }
 0x1e6   :  { %347 = vmatpush.msrb.mxu1 %v309_v60  ;;  %536 = vmatpush.msra.mxu2 %v309_v60 }
 0x1e8   :  { %348 = vmatpush.msrb.mxu1 %v308_v63  ;;  %537 = vmatpush.msra.mxu2 %v308_v63  ;;  %v509_v63 = vperm.slane %v507_v61, 0 }
 0x1ea   :  { %349 = vmatpush.msrb.mxu1 %v307_v0  ;;  %538 = vmatpush.msra.mxu2 %v307_v0 }
 0x1ec   :  { %350 = vmatpush.msrb.mxu1 %v306_v1  ;;  %539 = vmatpush.msra.mxu2 %v306_v1 }
 0x1ed   :  { %529 = vmatmul.msk.f32.vlgmr.msra.gmra.mxu2 %vm322_vm2, %v319_v2  ;;  %528 = vmatmul.msk.f32.vlgmr.msrb.gmra.mxu1 %vm322_vm2, %v318_v3 }
 0x1ee   :  { %417 = vmatpush.msrb.mxu2 %v105_v4 }
 0x1f0   :  { %418 = vmatpush.msrb.mxu2 %v104_v5 }
 0x1f2   :  { %419 = vmatpush.msrb.mxu2 %v103_v6 }
 0x1f4   :  { %420 = vmatpush.msrb.mxu2 %v102_v7 }
 0x1f5   :  { %530 = vmatmul.msk.f32.gmra.mxu2 %vm322_vm2, %v320_v20 }
 0x1fd   :  { %531 = vmatmul.msk.f32.gmra.mxu2 %vm322_vm2, %v321_v8 }
 0x205   :  { %532 = vmatmul.msk.f32.vlgmr.msrb.gmra.mxu2 %vm322_vm2, %v311_v19 }
 0x20d   :  { %533 = vmatmul.msk.f32.gmra.mxu2 %vm322_vm2, %v313_v22 }
 0x215   :  { %534 = vmatmul.msk.f32.gmra.mxu2 %vm322_vm2, %v315_v23 }
 0x21d   :  { %535 = vmatmul.msk.f32.gmra.mxu2 %vm322_vm2, %v317_v32 }
 0x26a   :  { %v352_v15 = vpop.f32.mrf.mxu1 }
 0x26b   :  { %v394_v24 = vadd.f32 %v393_v10, %v352_v15 }
 0x270   :  { %v355_v39 = vpop.f32.mrf.mxu2 }
 0x271   :  { %v397_v21 = vadd.f32 %v396_v12, %v355_v39 }
 0x278   :  { %v358_v9 = vpop.f32.mrf.mxu2 }
 0x279   :  { %v400_v27 = vadd.f32 %v399_v18, %v358_v9 }
 0x280   :  { %v361_v11 = vpop.f32.mrf.mxu2 }
 0x281   :  { %v403_v42 = vadd.f32 %v402_v40, %v361_v11 }
 0x288   :  { %v422_v13 = vpop.f32.mrf.mxu2 }
 0x289   :  { %v423_v28 = vadd.f32 %v422_v13, %v394_v24 }
 0x28b   :  { %v458_v35 = vadd.f32 %v441_v14, %v423_v28 }
 0x28d   :  { %v462_v43 = vmax.f32 %v458_v35, 0.0 }
 0x28f   :  { %v490_v52 = vmul.f32 %v473_v37, %v462_v43 }
 0x290   :  { %v425_v16 = vpop.f32.mrf.mxu2 }
 0x291   :  { %v426_v25 = vadd.f32 %v425_v16, %v397_v21 }
 0x293   :  { %v459_v33 = vadd.f32 %v446_v17, %v426_v25 }
 0x295   :  { %v463_v41 = vmax.f32 %v459_v33, 0.0 }
 0x297   :  { %v491_v47 = vmul.f32 %v478_v45, %v463_v41 }
 0x298   :  { %v428_v30 = vpop.f32.mrf.mxu2 }
 0x299   :  { %v429_v34 = vadd.f32 %v428_v30, %v400_v27  ;;  %v494_v48 = vadd.f32 %v491_v47, %v490_v52 }
 0x29b   :  { %v460_v36 = vadd.f32 %v451_v26, %v429_v34 }
 0x29d   :  { %v464_v44 = vmax.f32 %v460_v36, 0.0 }
 0x29f   :  { %v492_v53 = vmul.f32 %v483_v51, %v464_v44 }
 0x2a0   :  { %v431_v46 = vpop.f32.mrf.mxu2 }
 0x2a1   :  { %v432_v50 = vadd.f32 %v431_v46, %v403_v42  ;;  %v495_v54 = vadd.f32 %v494_v48, %v492_v53 }
 0x2a3   :  { %v461_v31 = vadd.f32 %v456_v29, %v432_v50 }
 0x2a5   :  { %v465_v38 = vmax.f32 %v461_v31, 0.0 }
 0x2a7   :  { %v493_v55 = vmul.f32 %v488_v49, %v465_v38 }
 0x2a9   :  { %v496_v56 = vadd.f32 %v495_v54, %v493_v55 }
 0x2ab   :  { %v497_v57 = vrot.slane %v496_v56, 4 }
 0x2ad   :  { %v498_v58 = vadd.f32 %v497_v57, %v496_v56 }
 0x2af   :  { %v499_v59 = vrot.slane %v498_v58, 2 }
 0x2b1   :  { %v500_v60 = vadd.f32 %v499_v59, %v498_v58 }
 0x2b3   :  { %v501_v62 = vrot.slane %v500_v60, 1 }
 0x2b5   :  { %v502_v0 = vadd.f32 %v501_v62, %v500_v60 }
 0x2b7   :  { %v510_v1 = vadd.f32 %v509_v63, %v502_v0 }
 0x2b9   :  { %511 = vst [vmem:[%s884_s13] sm:$0x1] %v510_v1 }

</bundles_post_ra>
